<compile_context>
chip_gen: v6e
topology: v6e:2x2x1
jax: 0.10.0
libtpu: 0.0.40
codegen_flags: <defaults>
</compile_context>

<pallas_src>
import numpy as np
import jax
import jax.numpy as jnp
from jax import lax
from jax.experimental import pallas as pl
from jax.experimental.pallas import tpu as pltpu

EPS = 1e-3  # matches nn.BatchNorm2d(eps=0.001)


def _pick_bblk(B, C, target_rows=8):
    """Largest batch fold <= B that (roughly) fills 8 f32 sublanes and divides B."""
    want = max(1, target_rows // max(C, 1))
    bblk = min(B, want)
    while B % bblk:
        bblk -= 1
    return max(bblk, 1)


def _build_masks(dilations, H, W):
    """Static 0/1 validity masks for the zero-padded +/-d shifts (numpy, trace time)."""
    HW = H * W
    idx = np.arange(HW)
    wpos = idx % W
    rows = []
    for d in dilations:
        rows.append(idx - d * W >= 0)   # shift_h(-d): needs h-d >= 0
        rows.append(idx + d * W < HW)   # shift_h(+d): needs h+d <  H
        rows.append(wpos - d >= 0)      # shift_w(-d): needs w-d >= 0
        rows.append(wpos + d < W)       # shift_w(+d): needs w+d <  W
    return np.stack(rows).astype(np.float32)


def _make_dab_kernel(dilations, C, H, W, R):
    HW = H * W

    def kernel(x_ref, p_ref, p2_ref, w_ref, m_ref, out_ref):
        # x_ref:   (R, HW)    R = Bblk*C folded batch*channel rows, spatial on lanes
        # p_ref:   (R, 39)    bn_relu_1 + per-branch taps / BN / PReLU, per row
        # p2_ref:  (4R, 3)    folded bn_relu_2 scale/bias/alpha in concat-row order
        # w_ref:   (R, 4R)    batch-block-diagonal 1x1 conv weight
        # m_ref:   (12, HW)   static shift-validity masks (4 per dilation)
        # out_ref: (R, HW)
        x = x_ref[...]
        p = p_ref[...]

        def col(i):                       # (R, 1): broadcasts across lanes
            return p[:, i:i + 1]

        def bnprelu(v, base):
            y = v * col(base) + col(base + 1)
            return jnp.where(y > 0, y, col(base + 2) * y)

        def shifted(v, amt, mrow):
            # XLU lane rotate + precomputed 0/1 mask multiply (1 VPU op)
            return pltpu.roll(v, amt, 1) * m_ref[mrow:mrow + 1, :]

        y0 = bnprelu(x, 0)                # bn_relu_1

        groups = []
        for bi, d in enumerate(dilations):
            base = 3 + 12 * bi
            mrow = 4 * bi
            # depthwise dilated (3,1) conv along H: 3-tap shift-and-add on the VPU
            t = (col(base + 0) * shifted(y0, (d * W) % HW, mrow + 0)
                 + col(base + 1) * y0
                 + col(base + 2) * shifted(y0, (-d * W) % HW, mrow + 1))
            t = bnprelu(t, base + 3)
            # depthwise dilated (1,3) conv along W
            t = (col(base + 6) * shifted(t, d, mrow + 2)
                 + col(base + 7) * t
                 + col(base + 8) * shifted(t, HW - d, mrow + 3))
            t = bnprelu(t, base + 9)
            groups.append(t)
        groups.append(x)                  # concat group 3 is the raw input

        # concat -> single vectorized bn_relu_2 -> single 1x1-conv MXU dot
        z = jnp.concatenate(groups, axis=0)           # (4R, HW), tile-aligned pieces
        p2 = p2_ref[...]
        z = z * p2[:, 0:1] + p2[:, 1:2]
        z = jnp.where(z > 0, z, p2[:, 2:3] * z)

        out_ref[...] = jnp.dot(w_ref[...], z,
                               preferred_element_type=jnp.float32,
                               precision=lax.Precision.HIGHEST)

    return kernel


def dab_forward(x, params, dilations):
    B, C, H, W = x.shape
    HW = H * W
    bblk = _pick_bblk(B, C)
    R = bblk * C
    n_masks = 4 * len(dilations)

    P = params["P"]        # (C, 39)
    p2 = params["bn2"]     # (4C, 3)
    w1 = params["w1x1"]    # (C, 4C)

    # Pre-tile per-channel params to the folded (Bblk*C)-row layout.
    P_t = jnp.tile(P, (bblk, 1))                                          # (R, 39)
    p2_t = jnp.tile(p2.reshape(4, 1, C, 3), (1, bblk, 1, 1)).reshape(4 * R, 3)
    # Batch-block-diagonal 1x1 conv weight: row b*C+o, col g*R + b'*C + i.
    w1g = w1.reshape(C, 4, C)                                             # (o, g, i)
    Wbig = jnp.einsum("bd,ogi->bogdi", jnp.eye(bblk, dtype=w1.dtype), w1g)
    Wbig = Wbig.reshape(R, 4 * R)

    masks = jnp.asarray(_build_masks(dilations, H, W))                    # (12, HW)

    x2 = x.reshape(B * C, HW)     # rows ordered [batch-major, channel-minor]
    kernel = _make_dab_kernel(dilations, C, H, W, R)
    out = pl.pallas_call(
        kernel,
        out_shape=jax.ShapeDtypeStruct((B * C, HW), jnp.float32),
        grid=(B // bblk,),
        in_specs=[
            pl.BlockSpec((R, HW), lambda b: (b, 0)),
            pl.BlockSpec((R, 39), lambda b: (0, 0)),
            pl.BlockSpec((4 * R, 3), lambda b: (0, 0)),
            pl.BlockSpec((R, 4 * R), lambda b: (0, 0)),
            pl.BlockSpec((n_masks, HW), lambda b: (0, 0)),
        ],
        out_specs=pl.BlockSpec((R, HW), lambda b: (b, 0)),
        compiler_params=pltpu.CompilerParams(
            dimension_semantics=("parallel",)),    # fills both v7x TensorCores at larger B
    )(x2, P_t, p2_t, Wbig, masks)
    return out.reshape(B, C, H, W)


# ---------------- deterministic parameter construction ----------------

def _make_bn(key, n):
    k1, k2, k3, k4, k5 = jax.random.split(key, 5)
    gamma = 1.0 + 0.1 * jax.random.normal(k1, (n,), jnp.float32)
    beta = 0.1 * jax.random.normal(k2, (n,), jnp.float32)
    mean = 0.1 * jax.random.normal(k3, (n,), jnp.float32)
    var = jax.random.uniform(k4, (n,), jnp.float32, 0.5, 1.5)
    alpha = jax.random.uniform(k5, (n,), jnp.float32, 0.1, 0.4)   # PReLU weight
    scale = gamma / jnp.sqrt(var + EPS)
    bias = beta - mean * scale
    return scale, bias, alpha


def build_params(key, C):
    keys = jax.random.split(key, 16)
    cols = []
    s1, b1, a1 = _make_bn(keys[0], C)
    cols += [s1, b1, a1]
    ki = 1
    branch_ref = []
    for _ in range(3):
        wh = 0.3 * jax.random.normal(keys[ki], (C, 3), jnp.float32); ki += 1  # (3,1) dw conv
        sh, bh, ah = _make_bn(keys[ki], C); ki += 1
        wv = 0.3 * jax.random.normal(keys[ki], (C, 3), jnp.float32); ki += 1  # (1,3) dw conv
        sv, bv, av = _make_bn(keys[ki], C); ki += 1
        cols += [wh[:, 0], wh[:, 1], wh[:, 2], sh, bh, ah,
                 wv[:, 0], wv[:, 1], wv[:, 2], sv, bv, av]
        branch_ref.append((wh, (sh, bh, ah), wv, (sv, bv, av)))
    P = jnp.stack(cols, axis=1)                                   # (C, 39) lane-major
    s2, b2, a2 = _make_bn(keys[13], 4 * C)
    w1 = 0.3 * jax.random.normal(keys[14], (C, 4 * C), jnp.float32)  # conv1x1 weight
    p2 = jnp.stack([s2, b2, a2], axis=1)                          # (4C, 3)
    params = {"P": P, "bn2": p2, "w1x1": w1}
    ref = {"bn1": (s1, b1, a1), "branches": branch_ref,
           "bn2": (s2, b2, a2), "w1x1": w1}
    return params, ref


# ---------------- pure-JAX reference (shift/pad based, no Pallas) ----------------

def ref_forward(x, ref, dilations):
    def bnprelu(v, p):
        s, b, a = p
        y = v * s[None, :, None, None] + b[None, :, None, None]
        return jnp.where(y > 0, y, a[None, :, None, None] * y)

    def dwconv_h(v, w, d):
        _, _, H, _ = v.shape
        vp = jnp.pad(v, ((0, 0), (0, 0), (d, d), (0, 0)))
        out = jnp.zeros_like(v)
        for k in range(3):
            out = out + w[None, :, k, None, None] * vp[:, :, k * d:k * d + H, :]
        return out

    def dwconv_w(v, w, d):
        _, _, _, W = v.shape
        vp = jnp.pad(v, ((0, 0), (0, 0), (0, 0), (d, d)))
        out = jnp.zeros_like(v)
        for k in range(3):
            out = out + w[None, :, k, None, None] * vp[:, :, :, k * d:k * d + W]
        return out

    y0 = bnprelu(x, ref["bn1"])
    brs = []
    for (wh, bnh, wv, bnv), d in zip(ref["branches"], dilations):
        t = bnprelu(dwconv_h(y0, wh, d), bnh)
        t = bnprelu(dwconv_w(t, wv, d), bnv)
        brs.append(t)
    cat = jnp.concatenate(brs + [x], axis=1)
    z = bnprelu(cat, ref["bn2"])
    return jnp.einsum("oi,bihw->bohw", ref["w1x1"], z,
                      precision=lax.Precision.HIGHEST)


if __name__ == "__main__":
    key = jax.random.PRNGKey(0)
    kx, kp = jax.random.split(key)
    B, C, H, W = 2, 4, 16, 16
    dilations = (1, 2, 4)  # d = (d0, d1, d2) of DABModule
    x = jax.random.normal(kx, (B, C, H, W), jnp.float32)
    params, ref = build_params(kp, C)

    out = dab_forward(x, params, dilations)
    out = jax.block_until_ready(out)

    expected = ref_forward(x, ref, dilations)
    np.testing.assert_allclose(np.asarray(out), np.asarray(expected),
                               rtol=1e-3, atol=1e-3)
    print("KERNEL_OK")
</pallas_src>

<mosaic_0001>
module attributes {stable_mosaic.version = 11 : i64} {
  func.func @kernel(%arg0: i32, %arg1: memref<8x256xf32, #tpu.memory_space<vmem>>, %arg2: memref<8x39xf32, #tpu.memory_space<vmem>>, %arg3: memref<32x3xf32, #tpu.memory_space<vmem>>, %arg4: memref<8x32xf32, #tpu.memory_space<vmem>>, %arg5: memref<12x256xf32, #tpu.memory_space<vmem>>, %arg6: memref<8x256xf32, #tpu.memory_space<vmem>>) attributes {dimension_semantics = [#tpu.dimension_semantics<parallel>], iteration_bounds = array<i64: 1>, scalar_prefetch = 0 : i64, scratch_operands = 0 : i64, tpu.core_type = #tpu.core_type<tc>, window_params = [{transform_indices = @transform_0, window_bounds = array<i64: 8, 256>}, {pipeline_mode = #tpu.pipeline_mode<synchronous>, transform_indices = @transform_1, window_bounds = array<i64: 8, 39>}, {pipeline_mode = #tpu.pipeline_mode<synchronous>, transform_indices = @transform_2, window_bounds = array<i64: 32, 3>}, {pipeline_mode = #tpu.pipeline_mode<synchronous>, transform_indices = @transform_3, window_bounds = array<i64: 8, 32>}, {pipeline_mode = #tpu.pipeline_mode<synchronous>, transform_indices = @transform_4, window_bounds = array<i64: 12, 256>}, {transform_indices = @transform_5, window_bounds = array<i64: 8, 256>}]} {
    %c0 = arith.constant 0 : index
    %c0_0 = arith.constant 0 : index
    %0 = vector.load %arg1[%c0, %c0_0] : memref<8x256xf32, #tpu.memory_space<vmem>>, vector<8x256xf32>
    %c0_1 = arith.constant 0 : index
    %c0_2 = arith.constant 0 : index
    %1 = vector.load %arg2[%c0_1, %c0_2] : memref<8x39xf32, #tpu.memory_space<vmem>>, vector<8x39xf32>
    %2 = vector.extract_strided_slice %1 {offsets = [0, 0], sizes = [8, 1], strides = [1, 1]} : vector<8x39xf32> to vector<8x1xf32>
    %3 = vector.broadcast %2 : vector<8x1xf32> to vector<8x256xf32>
    %4 = arith.mulf %0, %3 : vector<8x256xf32>
    %5 = vector.extract_strided_slice %1 {offsets = [0, 1], sizes = [8, 1], strides = [1, 1]} : vector<8x39xf32> to vector<8x1xf32>
    %6 = vector.broadcast %5 : vector<8x1xf32> to vector<8x256xf32>
    %7 = arith.addf %4, %6 : vector<8x256xf32>
    %cst = arith.constant 0.000000e+00 : f32
    %8 = vector.broadcast %cst : f32 to vector<8x256xf32>
    %9 = arith.cmpf ogt, %7, %8 : vector<8x256xf32>
    %10 = vector.extract_strided_slice %1 {offsets = [0, 2], sizes = [8, 1], strides = [1, 1]} : vector<8x39xf32> to vector<8x1xf32>
    %11 = vector.broadcast %10 : vector<8x1xf32> to vector<8x256xf32>
    %12 = arith.mulf %11, %7 : vector<8x256xf32>
    %13 = arith.select %9, %7, %12 : vector<8x256xi1>, vector<8x256xf32>
    %14 = vector.extract_strided_slice %1 {offsets = [0, 3], sizes = [8, 1], strides = [1, 1]} : vector<8x39xf32> to vector<8x1xf32>
    %c16_i32 = arith.constant 16 : i32
    %15 = tpu.dynamic_rotate %13 by %c16_i32 dim 1 : vector<8x256xf32>, i32 -> vector<8x256xf32>
    %c0_3 = arith.constant 0 : index
    %c0_4 = arith.constant 0 : index
    %16 = vector.load %arg5[%c0_3, %c0_4] : memref<12x256xf32, #tpu.memory_space<vmem>>, vector<1x256xf32>
    %17 = vector.broadcast %16 : vector<1x256xf32> to vector<8x256xf32>
    %18 = arith.mulf %15, %17 : vector<8x256xf32>
    %19 = vector.broadcast %14 : vector<8x1xf32> to vector<8x256xf32>
    %20 = arith.mulf %19, %18 : vector<8x256xf32>
    %21 = vector.extract_strided_slice %1 {offsets = [0, 4], sizes = [8, 1], strides = [1, 1]} : vector<8x39xf32> to vector<8x1xf32>
    %22 = vector.broadcast %21 : vector<8x1xf32> to vector<8x256xf32>
    %23 = arith.mulf %22, %13 : vector<8x256xf32>
    %24 = arith.addf %20, %23 : vector<8x256xf32>
    %25 = vector.extract_strided_slice %1 {offsets = [0, 5], sizes = [8, 1], strides = [1, 1]} : vector<8x39xf32> to vector<8x1xf32>
    %c240_i32 = arith.constant 240 : i32
    %26 = tpu.dynamic_rotate %13 by %c240_i32 dim 1 : vector<8x256xf32>, i32 -> vector<8x256xf32>
    %c1 = arith.constant 1 : index
    %c0_5 = arith.constant 0 : index
    %27 = vector.load %arg5[%c1, %c0_5] : memref<12x256xf32, #tpu.memory_space<vmem>>, vector<1x256xf32>
    %28 = vector.broadcast %27 : vector<1x256xf32> to vector<8x256xf32>
    %29 = arith.mulf %26, %28 : vector<8x256xf32>
    %30 = vector.broadcast %25 : vector<8x1xf32> to vector<8x256xf32>
    %31 = arith.mulf %30, %29 : vector<8x256xf32>
    %32 = arith.addf %24, %31 : vector<8x256xf32>
    %33 = vector.extract_strided_slice %1 {offsets = [0, 6], sizes = [8, 1], strides = [1, 1]} : vector<8x39xf32> to vector<8x1xf32>
    %34 = vector.broadcast %33 : vector<8x1xf32> to vector<8x256xf32>
    %35 = arith.mulf %32, %34 : vector<8x256xf32>
    %36 = vector.extract_strided_slice %1 {offsets = [0, 7], sizes = [8, 1], strides = [1, 1]} : vector<8x39xf32> to vector<8x1xf32>
    %37 = vector.broadcast %36 : vector<8x1xf32> to vector<8x256xf32>
    %38 = arith.addf %35, %37 : vector<8x256xf32>
    %cst_6 = arith.constant 0.000000e+00 : f32
    %39 = vector.broadcast %cst_6 : f32 to vector<8x256xf32>
    %40 = arith.cmpf ogt, %38, %39 : vector<8x256xf32>
    %41 = vector.extract_strided_slice %1 {offsets = [0, 8], sizes = [8, 1], strides = [1, 1]} : vector<8x39xf32> to vector<8x1xf32>
    %42 = vector.broadcast %41 : vector<8x1xf32> to vector<8x256xf32>
    %43 = arith.mulf %42, %38 : vector<8x256xf32>
    %44 = arith.select %40, %38, %43 : vector<8x256xi1>, vector<8x256xf32>
    %45 = vector.extract_strided_slice %1 {offsets = [0, 9], sizes = [8, 1], strides = [1, 1]} : vector<8x39xf32> to vector<8x1xf32>
    %c1_i32 = arith.constant 1 : i32
    %46 = tpu.dynamic_rotate %44 by %c1_i32 dim 1 : vector<8x256xf32>, i32 -> vector<8x256xf32>
    %c2 = arith.constant 2 : index
    %c0_7 = arith.constant 0 : index
    %47 = vector.load %arg5[%c2, %c0_7] : memref<12x256xf32, #tpu.memory_space<vmem>>, vector<1x256xf32>
    %48 = vector.broadcast %47 : vector<1x256xf32> to vector<8x256xf32>
    %49 = arith.mulf %46, %48 : vector<8x256xf32>
    %50 = vector.broadcast %45 : vector<8x1xf32> to vector<8x256xf32>
    %51 = arith.mulf %50, %49 : vector<8x256xf32>
    %52 = vector.extract_strided_slice %1 {offsets = [0, 10], sizes = [8, 1], strides = [1, 1]} : vector<8x39xf32> to vector<8x1xf32>
    %53 = vector.broadcast %52 : vector<8x1xf32> to vector<8x256xf32>
    %54 = arith.mulf %53, %44 : vector<8x256xf32>
    %55 = arith.addf %51, %54 : vector<8x256xf32>
    %56 = vector.extract_strided_slice %1 {offsets = [0, 11], sizes = [8, 1], strides = [1, 1]} : vector<8x39xf32> to vector<8x1xf32>
    %c255_i32 = arith.constant 255 : i32
    %57 = tpu.dynamic_rotate %44 by %c255_i32 dim 1 : vector<8x256xf32>, i32 -> vector<8x256xf32>
    %c3 = arith.constant 3 : index
    %c0_8 = arith.constant 0 : index
    %58 = vector.load %arg5[%c3, %c0_8] : memref<12x256xf32, #tpu.memory_space<vmem>>, vector<1x256xf32>
    %59 = vector.broadcast %58 : vector<1x256xf32> to vector<8x256xf32>
    %60 = arith.mulf %57, %59 : vector<8x256xf32>
    %61 = vector.broadcast %56 : vector<8x1xf32> to vector<8x256xf32>
    %62 = arith.mulf %61, %60 : vector<8x256xf32>
    %63 = arith.addf %55, %62 : vector<8x256xf32>
    %64 = vector.extract_strided_slice %1 {offsets = [0, 12], sizes = [8, 1], strides = [1, 1]} : vector<8x39xf32> to vector<8x1xf32>
    %65 = vector.broadcast %64 : vector<8x1xf32> to vector<8x256xf32>
    %66 = arith.mulf %63, %65 : vector<8x256xf32>
    %67 = vector.extract_strided_slice %1 {offsets = [0, 13], sizes = [8, 1], strides = [1, 1]} : vector<8x39xf32> to vector<8x1xf32>
    %68 = vector.broadcast %67 : vector<8x1xf32> to vector<8x256xf32>
    %69 = arith.addf %66, %68 : vector<8x256xf32>
    %cst_9 = arith.constant 0.000000e+00 : f32
    %70 = vector.broadcast %cst_9 : f32 to vector<8x256xf32>
    %71 = arith.cmpf ogt, %69, %70 : vector<8x256xf32>
    %72 = vector.extract_strided_slice %1 {offsets = [0, 14], sizes = [8, 1], strides = [1, 1]} : vector<8x39xf32> to vector<8x1xf32>
    %73 = vector.broadcast %72 : vector<8x1xf32> to vector<8x256xf32>
    %74 = arith.mulf %73, %69 : vector<8x256xf32>
    %75 = arith.select %71, %69, %74 : vector<8x256xi1>, vector<8x256xf32>
    %76 = vector.extract_strided_slice %1 {offsets = [0, 15], sizes = [8, 1], strides = [1, 1]} : vector<8x39xf32> to vector<8x1xf32>
    %c32_i32 = arith.constant 32 : i32
    %77 = tpu.dynamic_rotate %13 by %c32_i32 dim 1 : vector<8x256xf32>, i32 -> vector<8x256xf32>
    %c4 = arith.constant 4 : index
    %c0_10 = arith.constant 0 : index
    %78 = vector.load %arg5[%c4, %c0_10] : memref<12x256xf32, #tpu.memory_space<vmem>>, vector<1x256xf32>
    %79 = vector.broadcast %78 : vector<1x256xf32> to vector<8x256xf32>
    %80 = arith.mulf %77, %79 : vector<8x256xf32>
    %81 = vector.broadcast %76 : vector<8x1xf32> to vector<8x256xf32>
    %82 = arith.mulf %81, %80 : vector<8x256xf32>
    %83 = vector.extract_strided_slice %1 {offsets = [0, 16], sizes = [8, 1], strides = [1, 1]} : vector<8x39xf32> to vector<8x1xf32>
    %84 = vector.broadcast %83 : vector<8x1xf32> to vector<8x256xf32>
    %85 = arith.mulf %84, %13 : vector<8x256xf32>
    %86 = arith.addf %82, %85 : vector<8x256xf32>
    %87 = vector.extract_strided_slice %1 {offsets = [0, 17], sizes = [8, 1], strides = [1, 1]} : vector<8x39xf32> to vector<8x1xf32>
    %c224_i32 = arith.constant 224 : i32
    %88 = tpu.dynamic_rotate %13 by %c224_i32 dim 1 : vector<8x256xf32>, i32 -> vector<8x256xf32>
    %c5 = arith.constant 5 : index
    %c0_11 = arith.constant 0 : index
    %89 = vector.load %arg5[%c5, %c0_11] : memref<12x256xf32, #tpu.memory_space<vmem>>, vector<1x256xf32>
    %90 = vector.broadcast %89 : vector<1x256xf32> to vector<8x256xf32>
    %91 = arith.mulf %88, %90 : vector<8x256xf32>
    %92 = vector.broadcast %87 : vector<8x1xf32> to vector<8x256xf32>
    %93 = arith.mulf %92, %91 : vector<8x256xf32>
    %94 = arith.addf %86, %93 : vector<8x256xf32>
    %95 = vector.extract_strided_slice %1 {offsets = [0, 18], sizes = [8, 1], strides = [1, 1]} : vector<8x39xf32> to vector<8x1xf32>
    %96 = vector.broadcast %95 : vector<8x1xf32> to vector<8x256xf32>
    %97 = arith.mulf %94, %96 : vector<8x256xf32>
    %98 = vector.extract_strided_slice %1 {offsets = [0, 19], sizes = [8, 1], strides = [1, 1]} : vector<8x39xf32> to vector<8x1xf32>
    %99 = vector.broadcast %98 : vector<8x1xf32> to vector<8x256xf32>
    %100 = arith.addf %97, %99 : vector<8x256xf32>
    %cst_12 = arith.constant 0.000000e+00 : f32
    %101 = vector.broadcast %cst_12 : f32 to vector<8x256xf32>
    %102 = arith.cmpf ogt, %100, %101 : vector<8x256xf32>
    %103 = vector.extract_strided_slice %1 {offsets = [0, 20], sizes = [8, 1], strides = [1, 1]} : vector<8x39xf32> to vector<8x1xf32>
    %104 = vector.broadcast %103 : vector<8x1xf32> to vector<8x256xf32>
    %105 = arith.mulf %104, %100 : vector<8x256xf32>
    %106 = arith.select %102, %100, %105 : vector<8x256xi1>, vector<8x256xf32>
    %107 = vector.extract_strided_slice %1 {offsets = [0, 21], sizes = [8, 1], strides = [1, 1]} : vector<8x39xf32> to vector<8x1xf32>
    %c2_i32 = arith.constant 2 : i32
    %108 = tpu.dynamic_rotate %106 by %c2_i32 dim 1 : vector<8x256xf32>, i32 -> vector<8x256xf32>
    %c6 = arith.constant 6 : index
    %c0_13 = arith.constant 0 : index
    %109 = vector.load %arg5[%c6, %c0_13] : memref<12x256xf32, #tpu.memory_space<vmem>>, vector<1x256xf32>
    %110 = vector.broadcast %109 : vector<1x256xf32> to vector<8x256xf32>
    %111 = arith.mulf %108, %110 : vector<8x256xf32>
    %112 = vector.broadcast %107 : vector<8x1xf32> to vector<8x256xf32>
    %113 = arith.mulf %112, %111 : vector<8x256xf32>
    %114 = vector.extract_strided_slice %1 {offsets = [0, 22], sizes = [8, 1], strides = [1, 1]} : vector<8x39xf32> to vector<8x1xf32>
    %115 = vector.broadcast %114 : vector<8x1xf32> to vector<8x256xf32>
    %116 = arith.mulf %115, %106 : vector<8x256xf32>
    %117 = arith.addf %113, %116 : vector<8x256xf32>
    %118 = vector.extract_strided_slice %1 {offsets = [0, 23], sizes = [8, 1], strides = [1, 1]} : vector<8x39xf32> to vector<8x1xf32>
    %c254_i32 = arith.constant 254 : i32
    %119 = tpu.dynamic_rotate %106 by %c254_i32 dim 1 : vector<8x256xf32>, i32 -> vector<8x256xf32>
    %c7 = arith.constant 7 : index
    %c0_14 = arith.constant 0 : index
    %120 = vector.load %arg5[%c7, %c0_14] : memref<12x256xf32, #tpu.memory_space<vmem>>, vector<1x256xf32>
    %121 = vector.broadcast %120 : vector<1x256xf32> to vector<8x256xf32>
    %122 = arith.mulf %119, %121 : vector<8x256xf32>
    %123 = vector.broadcast %118 : vector<8x1xf32> to vector<8x256xf32>
    %124 = arith.mulf %123, %122 : vector<8x256xf32>
    %125 = arith.addf %117, %124 : vector<8x256xf32>
    %126 = vector.extract_strided_slice %1 {offsets = [0, 24], sizes = [8, 1], strides = [1, 1]} : vector<8x39xf32> to vector<8x1xf32>
    %127 = vector.broadcast %126 : vector<8x1xf32> to vector<8x256xf32>
    %128 = arith.mulf %125, %127 : vector<8x256xf32>
    %129 = vector.extract_strided_slice %1 {offsets = [0, 25], sizes = [8, 1], strides = [1, 1]} : vector<8x39xf32> to vector<8x1xf32>
    %130 = vector.broadcast %129 : vector<8x1xf32> to vector<8x256xf32>
    %131 = arith.addf %128, %130 : vector<8x256xf32>
    %cst_15 = arith.constant 0.000000e+00 : f32
    %132 = vector.broadcast %cst_15 : f32 to vector<8x256xf32>
    %133 = arith.cmpf ogt, %131, %132 : vector<8x256xf32>
    %134 = vector.extract_strided_slice %1 {offsets = [0, 26], sizes = [8, 1], strides = [1, 1]} : vector<8x39xf32> to vector<8x1xf32>
    %135 = vector.broadcast %134 : vector<8x1xf32> to vector<8x256xf32>
    %136 = arith.mulf %135, %131 : vector<8x256xf32>
    %137 = arith.select %133, %131, %136 : vector<8x256xi1>, vector<8x256xf32>
    %138 = vector.extract_strided_slice %1 {offsets = [0, 27], sizes = [8, 1], strides = [1, 1]} : vector<8x39xf32> to vector<8x1xf32>
    %c64_i32 = arith.constant 64 : i32
    %139 = tpu.dynamic_rotate %13 by %c64_i32 dim 1 : vector<8x256xf32>, i32 -> vector<8x256xf32>
    %c8 = arith.constant 8 : index
    %c0_16 = arith.constant 0 : index
    %140 = vector.load %arg5[%c8, %c0_16] : memref<12x256xf32, #tpu.memory_space<vmem>>, vector<1x256xf32>
    %141 = vector.broadcast %140 : vector<1x256xf32> to vector<8x256xf32>
    %142 = arith.mulf %139, %141 : vector<8x256xf32>
    %143 = vector.broadcast %138 : vector<8x1xf32> to vector<8x256xf32>
    %144 = arith.mulf %143, %142 : vector<8x256xf32>
    %145 = vector.extract_strided_slice %1 {offsets = [0, 28], sizes = [8, 1], strides = [1, 1]} : vector<8x39xf32> to vector<8x1xf32>
    %146 = vector.broadcast %145 : vector<8x1xf32> to vector<8x256xf32>
    %147 = arith.mulf %146, %13 : vector<8x256xf32>
    %148 = arith.addf %144, %147 : vector<8x256xf32>
    %149 = vector.extract_strided_slice %1 {offsets = [0, 29], sizes = [8, 1], strides = [1, 1]} : vector<8x39xf32> to vector<8x1xf32>
    %c192_i32 = arith.constant 192 : i32
    %150 = tpu.dynamic_rotate %13 by %c192_i32 dim 1 : vector<8x256xf32>, i32 -> vector<8x256xf32>
    %c9 = arith.constant 9 : index
    %c0_17 = arith.constant 0 : index
    %151 = vector.load %arg5[%c9, %c0_17] : memref<12x256xf32, #tpu.memory_space<vmem>>, vector<1x256xf32>
    %152 = vector.broadcast %151 : vector<1x256xf32> to vector<8x256xf32>
    %153 = arith.mulf %150, %152 : vector<8x256xf32>
    %154 = vector.broadcast %149 : vector<8x1xf32> to vector<8x256xf32>
    %155 = arith.mulf %154, %153 : vector<8x256xf32>
    %156 = arith.addf %148, %155 : vector<8x256xf32>
    %157 = vector.extract_strided_slice %1 {offsets = [0, 30], sizes = [8, 1], strides = [1, 1]} : vector<8x39xf32> to vector<8x1xf32>
    %158 = vector.broadcast %157 : vector<8x1xf32> to vector<8x256xf32>
    %159 = arith.mulf %156, %158 : vector<8x256xf32>
    %160 = vector.extract_strided_slice %1 {offsets = [0, 31], sizes = [8, 1], strides = [1, 1]} : vector<8x39xf32> to vector<8x1xf32>
    %161 = vector.broadcast %160 : vector<8x1xf32> to vector<8x256xf32>
    %162 = arith.addf %159, %161 : vector<8x256xf32>
    %cst_18 = arith.constant 0.000000e+00 : f32
    %163 = vector.broadcast %cst_18 : f32 to vector<8x256xf32>
    %164 = arith.cmpf ogt, %162, %163 : vector<8x256xf32>
    %165 = vector.extract_strided_slice %1 {offsets = [0, 32], sizes = [8, 1], strides = [1, 1]} : vector<8x39xf32> to vector<8x1xf32>
    %166 = vector.broadcast %165 : vector<8x1xf32> to vector<8x256xf32>
    %167 = arith.mulf %166, %162 : vector<8x256xf32>
    %168 = arith.select %164, %162, %167 : vector<8x256xi1>, vector<8x256xf32>
    %169 = vector.extract_strided_slice %1 {offsets = [0, 33], sizes = [8, 1], strides = [1, 1]} : vector<8x39xf32> to vector<8x1xf32>
    %c4_i32 = arith.constant 4 : i32
    %170 = tpu.dynamic_rotate %168 by %c4_i32 dim 1 : vector<8x256xf32>, i32 -> vector<8x256xf32>
    %c10 = arith.constant 10 : index
    %c0_19 = arith.constant 0 : index
    %171 = vector.load %arg5[%c10, %c0_19] : memref<12x256xf32, #tpu.memory_space<vmem>>, vector<1x256xf32>
    %172 = vector.broadcast %171 : vector<1x256xf32> to vector<8x256xf32>
    %173 = arith.mulf %170, %172 : vector<8x256xf32>
    %174 = vector.broadcast %169 : vector<8x1xf32> to vector<8x256xf32>
    %175 = arith.mulf %174, %173 : vector<8x256xf32>
    %176 = vector.extract_strided_slice %1 {offsets = [0, 34], sizes = [8, 1], strides = [1, 1]} : vector<8x39xf32> to vector<8x1xf32>
    %177 = vector.broadcast %176 : vector<8x1xf32> to vector<8x256xf32>
    %178 = arith.mulf %177, %168 : vector<8x256xf32>
    %179 = arith.addf %175, %178 : vector<8x256xf32>
    %180 = vector.extract_strided_slice %1 {offsets = [0, 35], sizes = [8, 1], strides = [1, 1]} : vector<8x39xf32> to vector<8x1xf32>
    %c252_i32 = arith.constant 252 : i32
    %181 = tpu.dynamic_rotate %168 by %c252_i32 dim 1 : vector<8x256xf32>, i32 -> vector<8x256xf32>
    %c11 = arith.constant 11 : index
    %c0_20 = arith.constant 0 : index
    %182 = vector.load %arg5[%c11, %c0_20] : memref<12x256xf32, #tpu.memory_space<vmem>>, vector<1x256xf32>
    %183 = vector.broadcast %182 : vector<1x256xf32> to vector<8x256xf32>
    %184 = arith.mulf %181, %183 : vector<8x256xf32>
    %185 = vector.broadcast %180 : vector<8x1xf32> to vector<8x256xf32>
    %186 = arith.mulf %185, %184 : vector<8x256xf32>
    %187 = arith.addf %179, %186 : vector<8x256xf32>
    %188 = vector.extract_strided_slice %1 {offsets = [0, 36], sizes = [8, 1], strides = [1, 1]} : vector<8x39xf32> to vector<8x1xf32>
    %189 = vector.broadcast %188 : vector<8x1xf32> to vector<8x256xf32>
    %190 = arith.mulf %187, %189 : vector<8x256xf32>
    %191 = vector.extract_strided_slice %1 {offsets = [0, 37], sizes = [8, 1], strides = [1, 1]} : vector<8x39xf32> to vector<8x1xf32>
    %192 = vector.broadcast %191 : vector<8x1xf32> to vector<8x256xf32>
    %193 = arith.addf %190, %192 : vector<8x256xf32>
    %cst_21 = arith.constant 0.000000e+00 : f32
    %194 = vector.broadcast %cst_21 : f32 to vector<8x256xf32>
    %195 = arith.cmpf ogt, %193, %194 : vector<8x256xf32>
    %196 = vector.extract_strided_slice %1 {offsets = [0, 38], sizes = [8, 1], strides = [1, 1]} : vector<8x39xf32> to vector<8x1xf32>
    %197 = vector.broadcast %196 : vector<8x1xf32> to vector<8x256xf32>
    %198 = arith.mulf %197, %193 : vector<8x256xf32>
    %199 = arith.select %195, %193, %198 : vector<8x256xi1>, vector<8x256xf32>
    %200 = tpu.concatenate %75, %137, %199, %0 in 0 : vector<8x256xf32>, vector<8x256xf32>, vector<8x256xf32>, vector<8x256xf32> -> vector<32x256xf32>
    %c0_22 = arith.constant 0 : index
    %c0_23 = arith.constant 0 : index
    %201 = vector.load %arg3[%c0_22, %c0_23] : memref<32x3xf32, #tpu.memory_space<vmem>>, vector<32x3xf32>
    %202 = vector.extract_strided_slice %201 {offsets = [0, 0], sizes = [32, 1], strides = [1, 1]} : vector<32x3xf32> to vector<32x1xf32>
    %203 = vector.broadcast %202 : vector<32x1xf32> to vector<32x256xf32>
    %204 = arith.mulf %200, %203 : vector<32x256xf32>
    %205 = vector.extract_strided_slice %201 {offsets = [0, 1], sizes = [32, 1], strides = [1, 1]} : vector<32x3xf32> to vector<32x1xf32>
    %206 = vector.broadcast %205 : vector<32x1xf32> to vector<32x256xf32>
    %207 = arith.addf %204, %206 : vector<32x256xf32>
    %cst_24 = arith.constant 0.000000e+00 : f32
    %208 = vector.broadcast %cst_24 : f32 to vector<32x256xf32>
    %209 = arith.cmpf ogt, %207, %208 : vector<32x256xf32>
    %210 = vector.extract_strided_slice %201 {offsets = [0, 2], sizes = [32, 1], strides = [1, 1]} : vector<32x3xf32> to vector<32x1xf32>
    %211 = vector.broadcast %210 : vector<32x1xf32> to vector<32x256xf32>
    %212 = arith.mulf %211, %207 : vector<32x256xf32>
    %213 = arith.select %209, %207, %212 : vector<32x256xi1>, vector<32x256xf32>
    %c0_25 = arith.constant 0 : index
    %c0_26 = arith.constant 0 : index
    %214 = vector.load %arg4[%c0_25, %c0_26] : memref<8x32xf32, #tpu.memory_space<vmem>>, vector<8x32xf32>
    %cst_27 = arith.constant dense<0.000000e+00> : vector<8x256xf32>
    %215 = tpu.matmul %214, %213, %cst_27 {dimension_numbers = #tpu.dot_dimension_numbers<[1], [0], [0], [1], [0, 0, 1, 1], [], []>, precision = #tpu.contract_precision<fp32>} : vector<8x32xf32>, vector<32x256xf32>, vector<8x256xf32> -> vector<8x256xf32>
    %c0_28 = arith.constant 0 : index
    %c0_29 = arith.constant 0 : index
    %216 = vector.load %arg6[%c0_28, %c0_29] : memref<8x256xf32, #tpu.memory_space<vmem>>, vector<8x256xf32>
    tpu.vector_store %arg6[%c0_28, %c0_29], %215 {strides = array<i32>} : memref<8x256xf32, #tpu.memory_space<vmem>>, vector<8x256xf32>,
    return
  }
  func.func @transform_0(%arg0: i32) -> (i32, i32) {
    %c0_i32 = arith.constant 0 : i32
    %c0_i32_0 = arith.constant 0 : i32
    return %arg0, %c0_i32 : i32, i32
  }
  func.func @transform_1(%arg0: i32) -> (i32, i32) {
    %c0_i32 = arith.constant 0 : i32
    %c0_i32_0 = arith.constant 0 : i32
    %c0_i32_1 = arith.constant 0 : i32
    return %c0_i32, %c0_i32_0 : i32, i32
  }
  func.func @transform_2(%arg0: i32) -> (i32, i32) {
    %c0_i32 = arith.constant 0 : i32
    %c0_i32_0 = arith.constant 0 : i32
    %c0_i32_1 = arith.constant 0 : i32
    return %c0_i32, %c0_i32_0 : i32, i32
  }
  func.func @transform_3(%arg0: i32) -> (i32, i32) {
    %c0_i32 = arith.constant 0 : i32
    %c0_i32_0 = arith.constant 0 : i32
    %c0_i32_1 = arith.constant 0 : i32
    return %c0_i32, %c0_i32_0 : i32, i32
  }
  func.func @transform_4(%arg0: i32) -> (i32, i32) {
    %c0_i32 = arith.constant 0 : i32
    %c0_i32_0 = arith.constant 0 : i32
    %c0_i32_1 = arith.constant 0 : i32
    return %c0_i32, %c0_i32_0 : i32, i32
  }
  func.func @transform_5(%arg0: i32) -> (i32, i32) {
    %c0_i32 = arith.constant 0 : i32
    %c0_i32_0 = arith.constant 0 : i32
    return %arg0, %c0_i32 : i32, i32
  }
}

</mosaic_0001>

<bundles_post_ra>
// kernel: tpu_custom_call.1
= control target key start
LH: loop header
LB: loop body
LE: loop exit
PB: predicated region body
PF: predicated region fallthrough
CT: control target
= control target key end

     0   :  { %10 = vsyncpa [#allocation3], 0  ;;  %s2000_s0 = inlined_call_operand.hbm [shape: f32[8,256], index: 0, kind: input, shape index: {}]   ;;  %s2001_s1 = inlined_call_operand.vmem [shape: f32[8,39], index: 1, kind: input, shape index: {}]   ;;  %s2002_s2 = inlined_call_operand.vmem [shape: f32[32,3], index: 2, kind: input, shape index: {}]   ;;  %s2003_s3 = inlined_call_operand.hbm [shape: f32[8,32], index: 3, kind: input, shape index: {}]   ;;  %s2004_s4 = inlined_call_operand.vmem [shape: f32[12,256], index: 4, kind: input, shape index: {}]   ;;  %s2005_s5 = inlined_call_operand.hbm [shape: f32[8,256], index: 5, kind: output, shape index: {}]  }
   0x1   :  { %11 = vsyncpa [#allocation6], 0 }
   0x2   :  { %12 = vsyncpa [#allocation4], 0  ;;  %s1434_s18 = smov [#allocation2]   ;;  %s1435_s20 = smov [#allocation5]  }
   0x3   :  { %s19_s19 = sshll.u32 %s1434_s18, 4  ;;  %s33_s21 = sshll.u32 %s1435_s20, 4  ;;  %s20_s19 = int_to_ptr.vmem [resolvable:$true] %s19_s19  ;;  %s34_s21 = int_to_ptr.vmem [resolvable:$true] %s33_s21 }
   0x4   :  { %s1376_s22 = scalar_lea.vmem %s20_s19, 256  ;;  %p1381_p1 = scmp.lt.s32.totalorder %s20_s19, %s20_s19 }
   0x5   :  { %p1377_p0 = scmp.ne.s32.totalorder %s20_s19, %s1376_s22  ;;  %p1382_p2 = scmp.lt.s32.totalorder %s1376_s22, %s1376_s22 }
   0x7   :  { %p1383_p3 = por %p1382_p2, %p1381_p1 }
   0x9   :  { %p1384_p4 = pnand %p1383_p3, %p1377_p0 }
   0xb   :  { %1387 = shalt.err (!%p1384_p4)
}
   0xc   :  { %22 = dma.hbm_to_vmem [thread:$0]  %s2000_s0, 256, %s20_s19, [#allocation3]  }
   0xd   :  { %s1396_s25 = scalar_lea.vmem %s34_s21, 128  ;;  %p1401_p6 = scmp.lt.s32.totalorder %s34_s21, %s34_s21 }
   0xe   :  { %p1397_p5 = scmp.ne.s32.totalorder %s34_s21, %s1396_s25  ;;  %p1402_p7 = scmp.lt.s32.totalorder %s1396_s25, %s1396_s25 }
  0x10   :  { %p1403_p8 = por %p1402_p7, %p1401_p6 }
  0x12   :  { %p1404_p9 = pnand %p1403_p8, %p1397_p5 }
  0x14   :  { %1407 = shalt.err (!%p1404_p9)
}
  0x15   :  { %36 = dma.hbm_to_vmem [thread:$0]  %s2003_s3, 128, %s34_s21, [#allocation6]  }
  0x16   :  { %1428 = dma.done.wait [#allocation3], 256  }
  0x17   :  { %1429 = vsyncadd [#allocation3], 4294967040 }
  0x18   :  { %1430 = dma.done.wait [#allocation6], 128  }
  0x19   :  { %1431 = vsyncadd [#allocation6], 4294967168  ;;  %v1436_v0 = vmov 2   ;;  %v1437_v1 = vmov 0   ;;  %v1529_v2 = vld [vmem:[%s2001_s1] sm:$0xff]  ;;  %v1438_v3 = vmov 27  }
  0x1a   :  { %1322 = vset.pattern.permute.xlu1 %v1436_v0  ;;  %1320 = vset.pattern.permute.xlu0 %v1437_v1  ;;  %v1439_v4 = vmov 1   ;;  %v1440_v5 = vmov 28   ;;  %v1441_v6 = vmov 15   ;;  %v1442_v7 = vmov 16   ;;  %v1557_v30 = vld [vmem:[#allocation2] sm:$0xff]  ;;  %v1559_v31 = vld [vmem:[#allocation2 + $0x8] sm:$0xff] }
  0x1b   :  { %64 = vperm.xlu1 %1322, %v1529_v2   ;;  %50 = vperm.xlu0 %1320, %v1529_v2   ;;  %v1443_v8 = vmov 3   ;;  %v1444_v9 = vmov 29   ;;  %v1445_v10 = vmov 5   ;;  %v1446_v11 = vmov 4   ;;  %s1463_s1 = smov 64   ;;  %s1464_s3 = smov 32  }
  0x1c   :  { %v1447_v12 = vmov 30   ;;  %v1448_v13 = vmov 17   ;;  %v1449_v14 = vmov 18   ;;  %v1450_v15 = vmov 31   ;;  %s1465_s29 = smov 16   ;;  %s1469_s30 = smov 96  }
  0x1d   :  { %v1451_v16 = vmov 19   ;;  %v1452_v17 = vmov 6   ;;  %v1453_v18 = vmov 20   ;;  %v1454_v19 = vmov 32   ;;  %s1472_s6 = smov 112   ;;  %v1611_v60 = vld [vmem:[%s2002_s2 + $0x18] sm:$0xff] }
  0x1e   :  { %v1455_v20 = vmov 34   ;;  %v1456_v21 = vmov 7   ;;  %v1457_v22 = vmov 35   ;;  %v1458_v23 = vmov 8   ;;  %v1619_v62 = vld [vmem:[%s2002_s2 + $0x10] sm:$0xff]  ;;  %s1480_s17 = smov 4  }
  0x1f   :  { %1323 = vset.pattern.permute.xlu1 %v1438_v3  ;;  %1321 = vset.pattern.permute.xlu0 %v1439_v4  ;;  %v1459_v24 = vmov 33   ;;  %v1460_v25 = vmov 21   ;;  %v1461_v26 = vmov 22   ;;  %v1462_v27 = vmov 9   ;;  %s1481_s26 = smov 2   ;;  %s1482_s27 = smov 124  }
  0x20   :  { %447 = vperm.xlu1 %1323, %v1529_v2   ;;  %56 = vperm.xlu0 %1321, %v1529_v2   ;;  %v1466_v47 = vmov 10   ;;  %v1467_v51 = vmov 23   ;;  %v1468_v52 = vmov 37   ;;  %v1470_v53 = vmov 11   ;;  %s1483_s0 = smov 1  }
  0x21   :  { %v1471_v54 = vmov 36   ;;  %v1473_v55 = vmov 24   ;;  %v1474_v56 = vmov 25   ;;  %v1475_v57 = vmov 12  }
  0x22   :  { %v1476_v58 = vmov 13   ;;  %v1477_v59 = vmov 38   ;;  %v1478_v61 = vmov 26  }
  0x24   :  { %1324 = vset.pattern.permute.xlu1 %v1440_v5  ;;  %1325 = vset.pattern.permute.xlu0 %v1441_v6  ;;  %v1479_v6 = vmov 14  }
  0x25   :  { %453 = vperm.xlu1 %1324, %v1529_v2   ;;  %271 = vperm.xlu0 %1325, %v1529_v2  }
  0x29   :  { %1326 = vset.pattern.permute.xlu1 %v1442_v7  ;;  %1328 = vset.pattern.permute.xlu0 %v1443_v8  ;;  %v1631_v7 = vld [vmem:[%s2002_s2 + $0x8] sm:$0xff] }
  0x2a   :  { %277 = vperm.xlu1 %1326, %v1529_v2   ;;  %95 = vperm.xlu0 %1328, %v1529_v2  }
  0x2e   :  { %1327 = vset.pattern.permute.xlu1 %v1444_v9  ;;  %1331 = vset.pattern.permute.xlu0 %v1445_v10 }
  0x2f   :  { %476 = vperm.xlu1 %1327, %v1529_v2   ;;  %131 = vperm.xlu0 %1331, %v1529_v2  }
  0x33   :  { %1329 = vset.pattern.permute.xlu1 %v1446_v11  ;;  %1332 = vset.pattern.permute.xlu0 %v1447_v12 }
  0x34   :  { %101 = vperm.xlu1 %1329, %v1529_v2   ;;  %484 = vperm.xlu0 %1332, %v1529_v2  }
  0x38   :  { %1330 = vset.pattern.permute.xlu1 %v1448_v13  ;;  %1333 = vset.pattern.permute.xlu0 %v1449_v14 }
  0x39   :  { %307 = vperm.xlu1 %1330, %v1529_v2   ;;  %315 = vperm.xlu0 %1333, %v1529_v2  }
  0x3d   :  { %1334 = vset.pattern.permute.xlu1 %v1450_v15  ;;  %1336 = vset.pattern.permute.xlu0 %v1451_v16  ;;  %v75_v16 = vlaneseq }
  0x3e   :  { %490 = vperm.xlu1 %1334, %v1529_v2   ;;  %321 = vperm.xlu0 %1336, %v1529_v2  }
  0x42   :  { %1335 = vset.pattern.permute.xlu1 %v1452_v17  ;;  %1339 = vset.pattern.permute.xlu0 %v1453_v18 }
  0x43   :  { %139 = vperm.xlu1 %1335, %v1529_v2   ;;  %329 = vperm.xlu0 %1339, %v1529_v2  }
  0x47   :  { %1337 = vset.pattern.permute.xlu1 %v1454_v19  ;;  %1342 = vset.pattern.permute.xlu0 %v1455_v20  ;;  %v83_v19 = vshrl.u32 %v75_v16, 7  ;;  %v1658_v20 = vand.u32 127, %v75_v16 }
  0x48   :  { %498 = vperm.xlu1 %1337, %v1529_v2   ;;  %534 = vperm.xlu0 %1342, %v1529_v2  }
  0x49   :  { %vm428_vm2 = vcmp.lt.s32.totalorder %v1658_v20, 64  ;;  %vm252_vm5 = vcmp.lt.s32.totalorder %v1658_v20, 32  ;;  %vm77_vm6 = vcmp.lt.s32.totalorder %v1658_v20, 16  ;;  %vm288_vm7 = vcmp.lt.s32.totalorder %v1658_v20, 96 }
  0x4a   :  { %vm112_vm8 = vcmp.lt.s32.totalorder %v1658_v20, 112  ;;  %vm509_vm13 = vcmp.lt.s32.totalorder %v1658_v20, 4  ;;  %vm545_vm14 = vcmp.lt.s32.totalorder %v1658_v20, 124  ;;  %vm340_vm15 = vcmp.lt.s32.totalorder %v1658_v20, 2 }
  0x4c   :  { %1338 = vset.pattern.permute.xlu1 %v1456_v21  ;;  %1345 = vset.pattern.permute.xlu0 %v1457_v22 }
  0x4d   :  { %145 = vperm.xlu1 %1338, %v1529_v2  }
  0x51   :  { %1340 = vset.pattern.permute.xlu1 %v1458_v23  ;;  %v1662_v23 = vsub.s32 0, %v83_v19 }
  0x52   :  { %153 = vperm.xlu1 %1340, %v1529_v2  }
  0x56   :  { %1341 = vset.pattern.permute.xlu1 %v1459_v24  ;;  %v1664_v24 = vsub.s32 1, %v83_v19 }
  0x57   :  { %528 = vperm.xlu1 %1341, %v1529_v2  }
  0x5b   :  { %1343 = vset.pattern.permute.xlu1 %v1460_v25  ;;  %v1262_v25 = vld [vmem:[%s2004_s4 + $0x10] ss:$8 sm:$0x3] }
  0x5c   :  { %359 = vperm.xlu1 %1343, %v1529_v2  }
  0x60   :  { %1344 = vset.pattern.permute.xlu1 %v1461_v26  ;;  %v1263_v26 = vld [vmem:[%s2004_s4 + $0x11] ss:$8 sm:$0x3] }
  0x61   :  { %365 = vperm.xlu1 %1344, %v1529_v2  }
  0x65   :  { %1346 = vset.pattern.permute.xlu1 %v1462_v27  ;;  %v437_v27 = vrot.slane %v1262_v25, %v1662_v23 }
  0x96   :  { %v51_v28 = vpop.permute.xlu0 %50  ;;  %v65_v29 = vpop.permute.xlu1 %64 }
  0x97   :  { %v53_v32 = vmul.f32 %v51_v28, %v1557_v30  ;;  %v54_v33 = vmul.f32 %v51_v28, %v1559_v31  ;;  %v441_v28 = vrot.slane %v1262_v25, %v1664_v24 }
  0x9b   :  { %v57_v34 = vpop.permute.xlu0 %56  ;;  %v1563_v35 = vpop.permute.xlu1 %447 }
  0x9c   :  { %v59_v36 = vadd.f32 %v57_v34, %v53_v32  ;;  %v60_v37 = vadd.f32 %v57_v34, %v54_v33  ;;  %v470_v32 = vrot.slane %v1263_v26, %v1664_v24 }
  0x9e   :  { %vm61_vm0 = vcmp.gt.f32.partialorder %v59_v36, 0.0  ;;  %vm62_vm1 = vcmp.gt.f32.partialorder %v60_v37, 0.0  ;;  %v67_v38 = vmul.f32 %v65_v29, %v59_v36  ;;  %v68_v39 = vmul.f32 %v65_v29, %v60_v37 }
  0x9f   :  { %v466_v29 = vrot.slane %v1263_v26, %v1662_v23 }
  0xa0   :  { %v1565_v40 = vsel %vm61_vm0, %v59_v36, %v67_v38  ;;  %v1567_v41 = vsel %vm62_vm1, %v60_v37, %v68_v39  ;;  %v1569_v42 = vpop.permute.xlu1 %453  ;;  %v1625_v5 = vpop.permute.xlu0 %271  ;;  %vm164_vm0 = vcmp.lt.s32.totalorder %v1658_v20, 1  ;;  %vm376_vm1 = vcmp.lt.s32.totalorder %v1658_v20, 126 }
  0xa1   :  { %426 = vrot.lane.b32.xlu0 %v1567_v41, %s1463_s1  ;;  %424 = vrot.lane.b32.xlu1 %v1565_v40, %s1463_s1 }
  0xa5   :  { %v278_v43 = vpop.permute.xlu1 %277  ;;  %250 = vrot.lane.b32.xlu0 %v1567_v41, %s1464_s3  ;;  %248 = vrot.lane.b32.xlu1 %v1565_v40, %s1464_s3  ;;  %v1636_v9 = vpop.permute.xlu0 %95  ;;  %s1484_s3 = smov 126  }
  0xa6   :  { %v1576_v44 = vmul.f32 %v278_v43, %v1565_v40  ;;  %v1579_v45 = vmul.f32 %v278_v43, %v1567_v41 }
  0xa9   :  { %71 = vrot.lane.b32.xlu0 %v1565_v40, %s1465_s29  ;;  %183 = vperm.xlu1 %1346, %v1529_v2  }
  0xaa   :  { %v1583_v46 = vpop.permute.xlu1 %476  ;;  %v1641_v11 = vpop.permute.xlu0 %131 }
  0xad   :  { %1347 = vset.pattern.permute.xlu1 %v1466_v47  ;;  %564 = vperm.xlu0 %1345, %v1529_v2  }
  0xae   :  { %189 = vperm.xlu1 %1347, %v1529_v2  }
  0xaf   :  { %v102_v48 = vpop.permute.xlu1 %101  ;;  %v485_v12 = vpop.permute.xlu0 %484 }
  0xb0   :  { %v1588_v49 = vmul.f32 %v102_v48, %v1565_v40  ;;  %v1591_v50 = vmul.f32 %v102_v48, %v1567_v41  ;;  %v456_v48 = vmul.f32 %v1569_v42, %v1565_v40 }
  0xb1   :  { %1348 = vset.pattern.permute.xlu0 %v1467_v51  ;;  %v457_v51 = vmul.f32 %v1569_v42, %v1567_v41 }
  0xb2   :  { %73 = vrot.lane.b32.xlu1 %v1567_v41, %s1465_s29  ;;  %395 = vperm.xlu0 %1348, %v1529_v2   ;;  %s1485_s29 = smov 127  }
  0xb3   :  { %1352 = vset.pattern.permute.xlu1 %v1468_v52 }
  0xb4   :  { %v1621_v63 = vpop.permute.xlu1 %307 }
  0xb6   :  { %284 = vrot.lane.b32.xlu1 %v1565_v40, %s1469_s30  ;;  %1349 = vset.pattern.permute.xlu0 %v1470_v53 }
  0xb7   :  { %219 = vperm.xlu0 %1349, %v1529_v2  }
  0xb9   :  { %v491_v3 = vpop.permute.xlu1 %490 }
  0xba   :  { %286 = vrot.lane.b32.xlu1 %v1567_v41, %s1469_s30 }
  0xbb   :  { %1350 = vset.pattern.permute.xlu0 %v1471_v54 }
  0xbc   :  { %572 = vperm.xlu0 %1350, %v1529_v2  }
  0xbe   :  { %108 = vrot.lane.b32.xlu1 %v1565_v40, %s1472_s6  ;;  %v1634_v8 = vpop.permute.xlu1 %139 }
  0xc0   :  { %1351 = vset.pattern.permute.xlu0 %v1473_v55 }
  0xc1   :  { %403 = vperm.xlu0 %1351, %v1529_v2  }
  0xc2   :  { %110 = vrot.lane.b32.xlu1 %v1567_v41, %s1472_s6 }
  0xc3   :  { %v499_v10 = vpop.permute.xlu1 %498 }
  0xc5   :  { %1354 = vset.pattern.permute.xlu0 %v1474_v56 }
  0xc6   :  { %578 = vperm.xlu1 %1352, %v1529_v2   ;;  %409 = vperm.xlu0 %1354, %v1529_v2  }
  0xca   :  { %1353 = vset.pattern.permute.xlu1 %v1475_v57  ;;  %1357 = vset.pattern.permute.xlu0 %v1476_v58 }
  0xcb   :  { %227 = vperm.xlu1 %1353, %v1529_v2   ;;  %233 = vperm.xlu0 %1357, %v1529_v2  }
  0xcf   :  { %1355 = vset.pattern.permute.xlu1 %v1477_v59  ;;  %1363 = vset.pattern.permute.xlu0 %v1437_v1 }
  0xd0   :  { %586 = vperm.xlu1 %1355, %v1529_v2  }
  0xd4   :  { %1356 = vset.pattern.permute.xlu1 %v1437_v1 }
  0xd5   :  { %614 = vperm.xlu1 %1356, %v1611_v60  }
  0xd9   :  { %1358 = vset.pattern.permute.xlu1 %v1478_v61 }
  0xda   :  { %417 = vperm.xlu1 %1358, %v1529_v2  }
  0xde   :  { %1359 = vset.pattern.permute.xlu1 %v1437_v1 }
  0xdf   :  { %609 = vperm.xlu1 %1359, %v1619_v62  }
  0xe3   :  { %1360 = vset.pattern.permute.xlu1 %v1479_v6 }
  0xe4   :  { %241 = vperm.xlu1 %1360, %v1529_v2   ;;  %v1644_v2 = vpop.permute.xlu1 %145 }
  0xe8   :  { %1361 = vset.pattern.permute.xlu1 %v1437_v1  ;;  %v1646_v13 = vpop.permute.xlu1 %153  ;;  %v1648_v1 = vpop.permute.xlu0 %315 }
  0xe9   :  { %604 = vperm.xlu1 %1361, %v1631_v7  }
  0xec   :  { %v1650_v14 = vpop.permute.xlu1 %528  ;;  %v1652_v15 = vpop.permute.xlu0 %321 }
  0xed   :  { %1362 = vset.pattern.permute.xlu1 %v1436_v0 }
  0xee   :  { %670 = vperm.xlu1 %1362, %v1611_v60  }
  0xf0   :  { %v1654_v17 = vpop.permute.xlu1 %359  ;;  %v1656_v18 = vpop.permute.xlu0 %329 }
  0xf2   :  { %1365 = vset.pattern.permute.xlu1 %v1439_v4 }
  0xf4   :  { %v1660_v21 = vpop.permute.xlu1 %365  ;;  %v535_v22 = vpop.permute.xlu0 %534 }
 0x113   :  { %v427_v33 = vpop.permute.xlu0 %426  ;;  %v425_v34 = vpop.permute.xlu1 %424 }
 0x114   :  { %v429_v36 = vsel %vm428_vm2, %v425_v34, %v427_v33  ;;  %v430_v37 = vsel %vm428_vm2, %v427_v33, %v425_v34 }
 0x115   :  { %v444_v38 = vmul.f32 %v437_v27, %v430_v37  ;;  %v445_v39 = vmul.f32 %v441_v28, %v429_v36  ;;  %v473_v43 = vmul.f32 %v466_v29, %v429_v36  ;;  %v474_v47 = vmul.f32 %v470_v32, %v430_v37 }
 0x117   :  { %v450_v52 = vmul.f32 %v1563_v35, %v444_v38  ;;  %v451_v53 = vmul.f32 %v1563_v35, %v445_v39  ;;  %v479_v56 = vmul.f32 %v1583_v46, %v473_v43  ;;  %v480_v57 = vmul.f32 %v1583_v46, %v474_v47  ;;  %v249_v40 = vpop.permute.xlu1 %248  ;;  %v251_v27 = vpop.permute.xlu0 %250  ;;  %v80_v38 = vld [vmem:[%s2004_s4] ss:$8 sm:$0x3] }
 0x118   :  { %v253_v33 = vsel %vm252_vm5, %v249_v40, %v251_v27  ;;  %v254_v34 = vsel %vm252_vm5, %v251_v27, %v249_v40  ;;  %v1255_v40 = vld [vmem:[%s2004_s4 + $0x1] ss:$8 sm:$0x3] }
 0x119   :  { %v458_v54 = vadd.f32 %v456_v48, %v450_v52  ;;  %v459_v55 = vadd.f32 %v457_v51, %v451_v53  ;;  %v85_v51 = vrot.slane %v80_v38, %v1662_v23  ;;  %v89_v52 = vrot.slane %v80_v38, %v1664_v24 }
 0x11b   :  { %v481_v58 = vadd.f32 %v479_v56, %v458_v54  ;;  %v482_v59 = vadd.f32 %v480_v57, %v459_v55  ;;  %v72_v48 = vpop.permute.xlu0 %71 }
 0x11d   :  { %v488_v61 = vmul.f32 %v485_v12, %v482_v59  ;;  %v487_v6 = vmul.f32 %v485_v12, %v481_v58 }
 0x11f   :  { %v494_v16 = vadd.f32 %v491_v3, %v488_v61  ;;  %v493_v19 = vadd.f32 %v491_v3, %v487_v6 }
 0x121   :  { %vm496_vm3 = vcmp.gt.f32.partialorder %v494_v16, 0.0  ;;  %v502_v25 = vmul.f32 %v499_v10, %v494_v16  ;;  %vm495_vm4 = vcmp.gt.f32.partialorder %v493_v19, 0.0  ;;  %v501_v41 = vmul.f32 %v499_v10, %v493_v19  ;;  %v1258_v10 = vld [vmem:[%s2004_s4 + $0x4] ss:$8 sm:$0x3] }
 0x122   :  { %v261_v28 = vrot.slane %v1258_v10, %v1662_v23  ;;  %v265_v29 = vrot.slane %v1258_v10, %v1664_v24 }
 0x123   :  { %v1685_v42 = vsel %vm496_vm3, %v494_v16, %v502_v25  ;;  %v1687_v35 = vsel %vm495_vm4, %v493_v19, %v501_v41  ;;  %vm200_vm3 = vcmp.lt.s32.totalorder %v1658_v20, 127  ;;  %vm690_vm4 = vcmask 261120  }
 0x124   :  { %507 = vrot.lane.b32.xlu1 %v1685_v42, %s1480_s17  ;;  %v1691_v46 = vmul.f32 %v535_v22, %v1685_v42  ;;  %v1693_v26 = vpop.permute.xlu1 %183  ;;  %505 = vrot.lane.b32.xlu0 %v1687_v35, %s1480_s17  ;;  %v1697_v3 = vmul.f32 %v535_v22, %v1687_v35  ;;  %v1259_v22 = vld [vmem:[%s2004_s4 + $0x5] ss:$8 sm:$0x3]  ;;  %v268_v36 = vmul.f32 %v261_v28, %v254_v34 }
 0x125   :  { %v269_v37 = vmul.f32 %v265_v29, %v253_v33  ;;  %v297_v43 = vrot.slane %v1259_v22, %v1662_v23  ;;  %v301_v47 = vrot.slane %v1259_v22, %v1664_v24  ;;  %v125_v33 = vrot.slane %v1255_v40, %v1664_v24 }
 0x126   :  { %v274_v53 = vmul.f32 %v1625_v5, %v268_v36 }
 0x127   :  { %v275_v54 = vmul.f32 %v1625_v5, %v269_v37 }
 0x128   :  { %v282_v25 = vadd.f32 %v1576_v44, %v274_v53 }
 0x129   :  { %v1699_v12 = vpop.permute.xlu1 %189  ;;  %v283_v41 = vadd.f32 %v1579_v45, %v275_v54 }
 0x12d   :  { %v74_v32 = vpop.permute.xlu1 %73 }
 0x12e   :  { %v78_v55 = vsel %vm77_vm6, %v72_v48, %v74_v32  ;;  %v79_v56 = vsel %vm77_vm6, %v74_v32, %v72_v48  ;;  %v121_v32 = vrot.slane %v1255_v40, %v1662_v23 }
 0x12f   :  { %v92_v16 = vmul.f32 %v85_v51, %v79_v56  ;;  %v93_v19 = vmul.f32 %v89_v52, %v78_v55 }
 0x131   :  { %v285_v39 = vpop.permute.xlu1 %284  ;;  %v98_v34 = vmul.f32 %v1636_v9, %v92_v16  ;;  %v99_v22 = vmul.f32 %v1636_v9, %v93_v19 }
 0x133   :  { %v106_v48 = vadd.f32 %v1588_v49, %v98_v34  ;;  %v107_v51 = vadd.f32 %v1591_v50, %v99_v22 }
 0x135   :  { %v287_v57 = vpop.permute.xlu1 %286 }
 0x136   :  { %v289_v58 = vsel %vm288_vm7, %v285_v39, %v287_v57  ;;  %v290_v59 = vsel %vm288_vm7, %v287_v57, %v285_v39 }
 0x137   :  { %v304_v61 = vmul.f32 %v297_v43, %v289_v58  ;;  %v305_v6 = vmul.f32 %v301_v47, %v290_v59 }
 0x139   :  { %v310_v10 = vmul.f32 %v1621_v63, %v304_v61  ;;  %v311_v5 = vmul.f32 %v1621_v63, %v305_v6  ;;  %v109_v27 = vpop.permute.xlu1 %108 }
 0x13b   :  { %v312_v28 = vadd.f32 %v310_v10, %v282_v25  ;;  %v313_v29 = vadd.f32 %v311_v5, %v283_v41 }
 0x13d   :  { %v111_v44 = vpop.permute.xlu1 %110  ;;  %v319_v45 = vmul.f32 %v1648_v1, %v313_v29  ;;  %v318_v36 = vmul.f32 %v1648_v1, %v312_v28 }
 0x13e   :  { %v113_v37 = vsel %vm112_vm8, %v109_v27, %v111_v44  ;;  %v114_v63 = vsel %vm112_vm8, %v111_v44, %v109_v27 }
 0x13f   :  { %v128_v38 = vmul.f32 %v121_v32, %v113_v37  ;;  %v129_v39 = vmul.f32 %v125_v33, %v114_v63  ;;  %v325_v43 = vadd.f32 %v1652_v15, %v319_v45  ;;  %v324_v47 = vadd.f32 %v1652_v15, %v318_v36  ;;  %v1264_v32 = vld [vmem:[%s2004_s4 + $0x12] ss:$8 sm:$0x3]  ;;  %v1265_v36 = vld [vmem:[%s2004_s4 + $0x13] ss:$8 sm:$0x3] }
 0x140   :  { %v518_v34 = vrot.slane %v1264_v32, %v1662_v23  ;;  %v522_v63 = vrot.slane %v1264_v32, %v1664_v24 }
 0x141   :  { %v134_v52 = vmul.f32 %v1641_v11, %v128_v38  ;;  %v135_v9 = vmul.f32 %v1641_v11, %v129_v39  ;;  %vm327_vm9 = vcmp.gt.f32.partialorder %v325_v43, 0.0  ;;  %v333_v53 = vmul.f32 %v1656_v18, %v325_v43 }
 0x142   :  { %vm326_vm10 = vcmp.gt.f32.partialorder %v324_v47, 0.0  ;;  %v332_v1 = vmul.f32 %v1656_v18, %v324_v47  ;;  %v554_v38 = vrot.slane %v1265_v36, %v1662_v23 }
 0x143   :  { %v136_v54 = vadd.f32 %v134_v52, %v106_v48  ;;  %v137_v55 = vadd.f32 %v135_v9, %v107_v51  ;;  %v335_v56 = vsel %vm327_vm9, %v325_v43, %v333_v53  ;;  %v558_v48 = vrot.slane %v1265_v36, %v1664_v24 }
 0x144   :  { %338 = vrot.lane.b32.xlu1 %v335_v56, %s1481_s26  ;;  %v1744_v15 = vmul.f32 %v1660_v21, %v335_v56  ;;  %v334_v49 = vsel %vm326_vm10, %v324_v47, %v332_v1  ;;  %v1260_v47 = vld [vmem:[%s2004_s4 + $0x6] ss:$8 sm:$0x3] }
 0x145   :  { %336 = vrot.lane.b32.xlu0 %v334_v49, %s1481_s26  ;;  %v1747_v50 = vmul.f32 %v1660_v21, %v334_v49  ;;  %v142_v11 = vmul.f32 %v1634_v8, %v136_v54  ;;  %v143_v57 = vmul.f32 %v1634_v8, %v137_v55 }
 0x147   :  { %v148_v58 = vadd.f32 %v1644_v2, %v142_v11  ;;  %v149_v18 = vadd.f32 %v1644_v2, %v143_v57 }
 0x148   :  { %541 = vrot.lane.b32.xlu1 %v1687_v35, %s1482_s27  ;;  %v593_v35 = vld [vmem:[%s2002_s2] sm:$0xff] }
 0x149   :  { %vm150_vm11 = vcmp.gt.f32.partialorder %v148_v58, 0.0  ;;  %v156_v59 = vmul.f32 %v1646_v13, %v148_v58  ;;  %vm151_vm12 = vcmp.gt.f32.partialorder %v149_v18, 0.0  ;;  %v157_v61 = vmul.f32 %v1646_v13, %v149_v18 }
 0x14b   :  { %v158_v6 = vsel %vm150_vm11, %v148_v58, %v156_v59  ;;  %v159_v21 = vsel %vm151_vm12, %v149_v18, %v157_v61 }
 0x14c   :  { %543 = vrot.lane.b32.xlu1 %v1685_v42, %s1482_s27  ;;  %160 = vrot.lane.b32.xlu0 %v158_v6, %s1483_s0  ;;  %v1758_v8 = vmul.f32 %v1699_v12, %v158_v6  ;;  %v1761_v2 = vmul.f32 %v1699_v12, %v159_v21  ;;  %v565_v12 = vpop.permute.xlu0 %564 }
 0x150   :  { %162 = vrot.lane.b32.xlu1 %v159_v21, %s1483_s0  ;;  %599 = vperm.xlu0 %1363, %v593_v35  }
 0x154   :  { %372 = vrot.lane.b32.xlu1 %v334_v49, %s1484_s3  ;;  %1364 = vset.pattern.permute.xlu0 %v1439_v4  ;;  %v1486_v4 = vmov 0.0   ;;  %v353_v49 = vrot.slane %v1260_v47, %v1664_v24 }
 0x155   :  { %638 = vperm.xlu0 %1364, %v1611_v60   ;;  %766 = vmatprep.mubr.f32.mxu0 %v1486_v4  ;;  %v1776_v60 = vpop.permute.xlu1 %578 }
 0x156   :  { %882 = vmatprep.mubr.f32.mxu1 %v1486_v4 }
 0x158   :  { %374 = vrot.lane.b32.xlu1 %v335_v56, %s1484_s3  ;;  %v349_v56 = vrot.slane %v1260_v47, %v1662_v23 }
 0x159   :  { %634 = vperm.xlu0 %1364, %v1619_v62   ;;  %v1778_v13 = vpop.permute.xlu1 %227 }
 0x15c   :  { %196 = vrot.lane.b32.xlu1 %v158_v6, %s1485_s29 }
 0x15d   :  { %626 = vperm.xlu0 %1364, %v593_v35   ;;  %v1780_v42 = vpop.permute.xlu1 %586 }
 0x160   :  { %198 = vrot.lane.b32.xlu1 %v159_v21, %s1485_s29 }
 0x161   :  { %1367 = vset.pattern.permute.xlu0 %v1436_v0  ;;  %v1782_v16 = vpop.permute.xlu1 %614 }
 0x164   :  { %630 = vperm.xlu1 %1365, %v1631_v7  }
 0x168   :  { %1366 = vset.pattern.permute.xlu1 %v1436_v0  ;;  %v1784_v0 = vpop.permute.xlu0 %395 }
 0x169   :  { %666 = vperm.xlu1 %1366, %v1619_v62   ;;  %v1786_v62 = vpop.permute.xlu1 %417 }
 0x16d   :  { %662 = vperm.xlu1 %1366, %v1631_v7   ;;  %v1788_v7 = vpop.permute.xlu0 %219  ;;  %v1790_v19 = vpop.permute.xlu1 %609 }
 0x171   :  { %658 = vperm.xlu1 %1366, %v593_v35   ;;  %v1792_v40 = vpop.permute.xlu0 %572  ;;  %v1794_v25 = vpop.permute.xlu1 %241 }
 0x175   :  { %v1796_v41 = vpop.permute.xlu0 %403  ;;  %v1798_v10 = vpop.permute.xlu1 %604 }
 0x179   :  { %v1800_v5 = vpop.permute.xlu0 %409  ;;  %v1802_v27 = vpop.permute.xlu1 %670 }
 0x17d   :  { %v1804_v28 = vpop.permute.xlu0 %233 }
 0x196   :  { %v508_v29 = vpop.permute.xlu1 %507  ;;  %v506_v33 = vpop.permute.xlu0 %505 }
 0x197   :  { %v511_v22 = vsel %vm509_vm13, %v508_v29, %v506_v33  ;;  %v510_v39 = vsel %vm509_vm13, %v506_v33, %v508_v29  ;;  %v1261_v29 = vld [vmem:[%s2004_s4 + $0x7] ss:$8 sm:$0x3]  ;;  %v1256_v33 = vld [vmem:[%s2004_s4 + $0x2] ss:$8 sm:$0x3] }
 0x198   :  { %v525_v45 = vmul.f32 %v518_v34, %v511_v22  ;;  %v526_v1 = vmul.f32 %v522_v63, %v510_v39  ;;  %v173_v63 = vrot.slane %v1256_v33, %v1662_v23 }
 0x19a   :  { %v531_v43 = vmul.f32 %v1650_v14, %v525_v45  ;;  %v532_v61 = vmul.f32 %v1650_v14, %v526_v1  ;;  %v389_v45 = vrot.slane %v1261_v29, %v1664_v24 }
 0x19c   :  { %v539_v55 = vadd.f32 %v1697_v3, %v531_v43  ;;  %v540_v14 = vadd.f32 %v1691_v46, %v532_v61  ;;  %v623_v61 = vmul.f32 %v1782_v16, %v1557_v30 }
 0x1b6   :  { %v339_v44 = vpop.permute.xlu1 %338 }
 0x1b7   :  { %v337_v52 = vpop.permute.xlu0 %336 }
 0x1b8   :  { %v341_v11 = vsel %vm340_vm15, %v337_v52, %v339_v44  ;;  %v342_v57 = vsel %vm340_vm15, %v339_v44, %v337_v52  ;;  %v385_v44 = vrot.slane %v1261_v29, %v1662_v23 }
 0x1b9   :  { %v356_v21 = vmul.f32 %v349_v56, %v342_v57  ;;  %v357_v35 = vmul.f32 %v353_v49, %v341_v11 }
 0x1ba   :  { %v542_v37 = vpop.permute.xlu1 %541 }
 0x1bb   :  { %v362_v36 = vmul.f32 %v1654_v17, %v356_v21 }
 0x1be   :  { %v544_v51 = vpop.permute.xlu1 %543  ;;  %v161_v22 = vpop.permute.xlu0 %160 }
 0x1bf   :  { %v546_v9 = vsel %vm545_vm14, %v542_v37, %v544_v51  ;;  %v547_v53 = vsel %vm545_vm14, %v544_v51, %v542_v37  ;;  %v363_v37 = vmul.f32 %v1654_v17, %v357_v35 }
 0x1c0   :  { %v561_v54 = vmul.f32 %v554_v38, %v546_v9  ;;  %v562_v58 = vmul.f32 %v558_v48, %v547_v53  ;;  %v177_v38 = vrot.slane %v1256_v33, %v1664_v24 }
 0x1c2   :  { %v567_v18 = vmul.f32 %v565_v12, %v561_v54  ;;  %v163_v59 = vpop.permute.xlu1 %162  ;;  %v568_v32 = vmul.f32 %v565_v12, %v562_v58  ;;  %v370_v54 = vadd.f32 %v1747_v50, %v362_v36  ;;  %v624_v50 = vmul.f32 %v1782_v16, %v1559_v31 }
 0x1c3   :  { %v166_v43 = vsel %vm164_vm0, %v163_v59, %v161_v22  ;;  %v165_v48 = vsel %vm164_vm0, %v161_v22, %v163_v59  ;;  %v1257_v59 = vld [vmem:[%s2004_s4 + $0x3] ss:$8 sm:$0x3]  ;;  %s1487_s4 = smov [#allocation7]  }
 0x1c4   :  { %v569_v6 = vadd.f32 %v567_v18, %v539_v55  ;;  %v570_v39 = vadd.f32 %v568_v32, %v540_v14  ;;  %v371_v55 = vadd.f32 %v1744_v15, %v363_v37  ;;  %v180_v56 = vmul.f32 %v173_v63, %v166_v43  ;;  %s1245_s16 = sshll.u32 %s1487_s4, 4  ;;  %s1246_s16 = int_to_ptr.vmem [resolvable:$true] %s1245_s16 }
 0x1c5   :  { %v181_v11 = vmul.f32 %v177_v38, %v165_v48  ;;  %v213_v29 = vrot.slane %v1257_v59, %v1664_v24  ;;  %s1408_s17 = scalar_lea.vmem %s1246_s16, 256  ;;  %p1413_p11 = scmp.lt.s32.totalorder %s1246_s16, %s1246_s16 }
 0x1c6   :  { %v575_v3 = vmul.f32 %v1792_v40, %v569_v6  ;;  %v373_v34 = vpop.permute.xlu1 %372  ;;  %v576_v49 = vmul.f32 %v1792_v40, %v570_v39  ;;  %v186_v32 = vmul.f32 %v1693_v26, %v180_v56  ;;  %p1409_p10 = scmp.ne.s32.totalorder %s1246_s16, %s1408_s17  ;;  %p1414_p12 = scmp.lt.s32.totalorder %s1408_s17, %s1408_s17 }
 0x1c8   :  { %v581_v12 = vadd.f32 %v1776_v60, %v575_v3  ;;  %v187_v3 = vmul.f32 %v1693_v26, %v181_v11  ;;  %v582_v30 = vadd.f32 %v1776_v60, %v576_v49  ;;  %v194_v37 = vadd.f32 %v1758_v8, %v186_v32  ;;  %p1415_p13 = por %p1414_p12, %p1413_p11 }
 0x1ca   :  { %v375_v47 = vpop.permute.xlu1 %374  ;;  %vm583_vm2 = vcmp.gt.f32.partialorder %v581_v12, 0.0  ;;  %v589_v46 = vmul.f32 %v1780_v42, %v581_v12  ;;  %vm584_vm7 = vcmp.gt.f32.partialorder %v582_v30, 0.0  ;;  %v590_v20 = vmul.f32 %v1780_v42, %v582_v30  ;;  %p1416_p0 = pnand %p1415_p13, %p1409_p10 }
 0x1cb   :  { %v377_v51 = vsel %vm376_vm1, %v373_v34, %v375_v47  ;;  %v378_v52 = vsel %vm376_vm1, %v375_v47, %v373_v34  ;;  %v1849_v9 = vpop.permute.xlu0 %599  ;;  %v689_v34 = vld [vmem:[#allocation5] sm:$0xff] }
 0x1cc   :  { %v392_v17 = vmul.f32 %v385_v44, %v377_v51  ;;  %v393_v53 = vmul.f32 %v389_v45, %v378_v52  ;;  %v1851_v1 = vsel %vm583_vm2, %v581_v12, %v589_v46  ;;  %v592_v48 = vsel %vm584_vm7, %v582_v30, %v590_v20 }
 0x1ce   :  { %v398_v57 = vmul.f32 %v1784_v0, %v392_v17  ;;  %v399_v58 = vmul.f32 %v1784_v0, %v393_v53  ;;  %v197_v18 = vpop.permute.xlu1 %196  ;;  %v209_v0 = vrot.slane %v1257_v59, %v1662_v23 }
 0x1d0   :  { %v400_v15 = vadd.f32 %v398_v57, %v370_v54  ;;  %v401_v6 = vadd.f32 %v399_v58, %v371_v55  ;;  %v639_v21 = vpop.permute.xlu0 %638  ;;  %v622_v58 = vmul.f32 %v1790_v19, %v592_v48 }
 0x1d1   :  { %v647_v40 = vadd.f32 %v639_v21, %v623_v61  ;;  %v648_v35 = vadd.f32 %v639_v21, %v624_v50 }
 0x1d2   :  { %v199_v33 = vpop.permute.xlu1 %198  ;;  %v406_v22 = vmul.f32 %v1796_v41, %v400_v15  ;;  %v407_v23 = vmul.f32 %v1796_v41, %v401_v6  ;;  %v195_v41 = vadd.f32 %v1761_v2, %v187_v3 }
 0x1d3   :  { %vm655_vm5 = vcmp.gt.f32.partialorder %v647_v40, 0.0  ;;  %vm656_vm6 = vcmp.gt.f32.partialorder %v648_v35, 0.0  ;;  %v679_v31 = vmul.f32 %v1802_v27, %v647_v40  ;;  %v680_v16 = vmul.f32 %v1802_v27, %v648_v35 }
 0x1d4   :  { %v201_v24 = vsel %vm200_vm3, %v197_v18, %v199_v33  ;;  %v202_v26 = vsel %vm200_vm3, %v199_v33, %v197_v18  ;;  %v692_v27 = vsel %vm690_vm4, %v689_v34, 0  ;;  %v412_v39 = vadd.f32 %v1800_v5, %v406_v22  ;;  %v635_v49 = vpop.permute.xlu0 %634 }
 0x1d5   :  { %v687_v14 = vsel %vm655_vm5, %v647_v40, %v679_v31  ;;  %v688_v60 = vsel %vm656_vm6, %v648_v35, %v680_v16  ;;  %v216_v44 = vmul.f32 %v209_v0, %v201_v24  ;;  %v217_v45 = vmul.f32 %v213_v29, %v202_v26 }
 0x1d6   :  { %v1879_v12 = vand.u32 4294901760, %v688_v60  ;;  %v1881_v36 = vand.u32 4294901760, %v687_v14  ;;  %v413_v43 = vadd.f32 %v1800_v5, %v407_v23  ;;  %v1903_v5 = vand.u32 4294901760, %v692_v27 }
 0x1d7   :  { %v222_v63 = vmul.f32 %v1788_v7, %v216_v44  ;;  %v223_v38 = vmul.f32 %v1788_v7, %v217_v45  ;;  %v420_v17 = vmul.f32 %v1786_v62, %v412_v39  ;;  %vm414_vm8 = vcmp.gt.f32.partialorder %v412_v39, 0.0 }
 0x1d8   :  { %719 = vmatprep.subr.mxu0 %v1879_v12  ;;  %v1894_v8 = vsub.f32 %v688_v60, %v1879_v12  ;;  %v1897_v2 = vsub.f32 %v687_v14, %v1881_v36  ;;  %v421_v53 = vmul.f32 %v1786_v62, %v413_v43  ;;  %vm415_vm9 = vcmp.gt.f32.partialorder %v413_v43, 0.0  ;;  %v627_v31 = vpop.permute.xlu0 %626 }
 0x1d9   :  { %v224_v47 = vadd.f32 %v222_v63, %v194_v37  ;;  %v225_v46 = vadd.f32 %v223_v38, %v195_v41  ;;  %721 = vmatpush1.msra.mxu0 %v1881_v36  ;;  %v422_v61 = vsel %vm414_vm8, %v412_v39, %v420_v17  ;;  %v646_v6 = vadd.f32 %v635_v49, %v622_v58 }
 0x1da   :  { %v804_v51 = vand.u32 4294901760, %v1894_v8  ;;  %v810_v52 = vand.u32 4294901760, %v1897_v2  ;;  %v423_v50 = vsel %vm415_vm9, %v413_v43, %v421_v53  ;;  %v1921_v35 = vsub.f32 %v692_v27, %v1903_v5 }
 0x1db   :  { %v230_v7 = vmul.f32 %v1778_v13, %v224_v47  ;;  %v231_v42 = vmul.f32 %v1778_v13, %v225_v46  ;;  %v620_v0 = vmul.f32 %v1798_v10, %v423_v50  ;;  %vm654_vm13 = vcmp.gt.f32.partialorder %v646_v6, 0.0 }
 0x1dc   :  { %v805_v13 = vsub.f32 %v1894_v8, %v804_v51  ;;  %v811_v56 = vsub.f32 %v1897_v2, %v810_v52  ;;  %v769_v22 = vand.u32 4294901760, %v1921_v35 }
 0x1dd   :  { %v237_v54 = vadd.f32 %v1804_v28, %v231_v42  ;;  %v236_v55 = vadd.f32 %v1804_v28, %v230_v7  ;;  %v621_v28 = vmul.f32 %v1790_v19, %v1851_v1 }
 0x1de   :  { %v806_v18 = vand.u32 4294901760, %v805_v13  ;;  %v812_v59 = vand.u32 4294901760, %v811_v56  ;;  %v770_v41 = vsub.f32 %v1921_v35, %v769_v22 }
 0x1df   :  { %v631_v11 = vpop.permute.xlu1 %630  ;;  %vm239_vm10 = vcmp.gt.f32.partialorder %v237_v54, 0.0  ;;  %v245_v57 = vmul.f32 %v1794_v25, %v237_v54  ;;  %vm238_vm11 = vcmp.gt.f32.partialorder %v236_v55, 0.0  ;;  %v244_v62 = vmul.f32 %v1794_v25, %v236_v55 }
 0x1e0   :  { %v645_v15 = vadd.f32 %v635_v49, %v621_v28  ;;  %807 = vmatprep.subr.mxu1 %v806_v18  ;;  %v619_v25 = vmul.f32 %v1798_v10, %v422_v61  ;;  %v644_v30 = vadd.f32 %v631_v11, %v620_v0 }
 0x1e1   :  { %v247_v21 = vsel %vm239_vm10, %v237_v54, %v245_v57  ;;  %v246_v40 = vsel %vm238_vm11, %v236_v55, %v244_v62  ;;  %813 = vmatpush1.msra.mxu1 %v812_v59  ;;  %v771_v55 = vand.u32 4294901760, %v770_v41 }
 0x1e2   :  { %v618_v19 = vmul.f32 %v1849_v9, %v247_v21  ;;  %v617_v29 = vmul.f32 %v1849_v9, %v246_v40  ;;  %vm653_vm12 = vcmp.gt.f32.partialorder %v645_v15, 0.0  ;;  %v643_v33 = vadd.f32 %v631_v11, %v619_v25 }
 0x1e3   :  { %vm652_vm15 = vcmp.gt.f32.partialorder %v644_v30, 0.0 }
 0x1e4   :  { %v667_v1 = vpop.permute.xlu1 %666  ;;  %v641_v26 = vadd.f32 %v627_v31, %v617_v29  ;;  %v642_v14 = vadd.f32 %v627_v31, %v618_v19  ;;  %vm651_vm14 = vcmp.gt.f32.partialorder %v643_v33, 0.0 }
 0x1e5   :  { %v677_v32 = vmul.f32 %v667_v1, %v645_v15  ;;  %v678_v3 = vmul.f32 %v667_v1, %v646_v6 }
 0x1e6   :  { %vm649_vm0 = vcmp.gt.f32.partialorder %v641_v26, 0.0  ;;  %vm650_vm1 = vcmp.gt.f32.partialorder %v642_v14, 0.0 }
 0x1e7   :  { %v685_v16 = vsel %vm653_vm12, %v645_v15, %v677_v32  ;;  %v686_v34 = vsel %vm654_vm13, %v646_v6, %v678_v3 }
 0x1e8   :  { %v1928_v23 = vand.u32 4294901760, %v686_v34  ;;  %v1930_v24 = vand.u32 4294901760, %v685_v16  ;;  %v663_v10 = vpop.permute.xlu1 %662 }
 0x1e9   :  { %v675_v60 = vmul.f32 %v663_v10, %v643_v33  ;;  %v676_v9 = vmul.f32 %v663_v10, %v644_v30 }
 0x1ea   :  { %v1933_v44 = vsub.f32 %v686_v34, %v1928_v23  ;;  %v1936_v45 = vsub.f32 %v685_v16, %v1930_v24  ;;  %723 = vmatprep.subr.mxu0 %v1928_v23 }
 0x1eb   :  { %v683_v27 = vsel %vm651_vm14, %v643_v33, %v675_v60  ;;  %v684_v37 = vsel %vm652_vm15, %v644_v30, %v676_v9  ;;  %725 = vmatpush1.msra.mxu0 %v1930_v24 }
 0x1ec   :  { %v1943_v63 = vand.u32 4294901760, %v684_v37  ;;  %v1945_v38 = vand.u32 4294901760, %v683_v27  ;;  %v659_v20 = vpop.permute.xlu1 %658  ;;  %v816_v39 = vand.u32 4294901760, %v1933_v44  ;;  %v822_v43 = vand.u32 4294901760, %v1936_v45 }
 0x1ed   :  { %v673_v47 = vmul.f32 %v659_v20, %v641_v26  ;;  %v674_v46 = vmul.f32 %v659_v20, %v642_v14 }
 0x1ee   :  { %v827_v7 = vsub.f32 %v684_v37, %v1943_v63  ;;  %v833_v42 = vsub.f32 %v683_v27, %v1945_v38  ;;  %727 = vmatprep.subr.mxu0 %v1943_v63  ;;  %v817_v48 = vsub.f32 %v1933_v44, %v816_v39  ;;  %v823_v17 = vsub.f32 %v1936_v45, %v822_v43 }
 0x1ef   :  { %v681_v53 = vsel %vm649_vm0, %v641_v26, %v673_v47  ;;  %v682_v54 = vsel %vm650_vm1, %v642_v14, %v674_v46  ;;  %729 = vmatpush1.msra.mxu0 %v1945_v38 }
 0x1f0   :  { %v1955_v13 = vand.u32 4294901760, %v682_v54  ;;  %v1957_v56 = vand.u32 4294901760, %v681_v53  ;;  %v818_v49 = vand.u32 4294901760, %v817_v48  ;;  %v824_v11 = vand.u32 4294901760, %v823_v17 }
 0x1f1   :  { %v828_v57 = vand.u32 4294901760, %v827_v7  ;;  %v834_v62 = vand.u32 4294901760, %v833_v42 }
 0x1f2   :  { %v839_v28 = vsub.f32 %v682_v54, %v1955_v13  ;;  %v845_v58 = vsub.f32 %v681_v53, %v1957_v56  ;;  %731 = vmatprep.subr.mxu0 %v1955_v13  ;;  %819 = vmatprep.subr.mxu1 %v818_v49 }
 0x1f3   :  { %733 = vmatpush1.msra.mxu0 %v1957_v56  ;;  %825 = vmatpush1.msra.mxu1 %v824_v11  ;;  %v829_v18 = vsub.f32 %v827_v7, %v828_v57  ;;  %v835_v59 = vsub.f32 %v833_v42, %v834_v62 }
 0x1f4   :  { %916 = vmatprep.subr.mxu0 %v1894_v8  ;;  %772 = vmatmul.mubr.f32.vlgmr.msra.gmra.mxu0 %v771_v55  ;;  %v840_v61 = vand.u32 4294901760, %v839_v28  ;;  %v846_v50 = vand.u32 4294901760, %v845_v58 }
 0x1f5   :  { %919 = vmatpush1.msra.mxu0 %v1897_v2  ;;  %v830_v15 = vand.u32 4294901760, %v829_v18  ;;  %v836_v6 = vand.u32 4294901760, %v835_v59  ;;  %970 = vmatprep.mubr.f32.mxu0 %v1486_v4 }
 0x1f6   :  { %922 = vmatprep.subr.mxu0 %v1933_v44  ;;  %v841_v21 = vsub.f32 %v839_v28, %v840_v61  ;;  %v847_v40 = vsub.f32 %v845_v58, %v846_v50 }
 0x1f7   :  { %831 = vmatprep.subr.mxu1 %v830_v15  ;;  %925 = vmatpush1.msra.mxu0 %v1936_v45 }
 0x1f8   :  { %837 = vmatpush1.msra.mxu1 %v836_v6  ;;  %928 = vmatprep.subr.mxu0 %v827_v7  ;;  %v842_v25 = vand.u32 4294901760, %v841_v21  ;;  %v848_v0 = vand.u32 4294901760, %v847_v40 }
 0x1f9   :  { %931 = vmatpush1.msra.mxu0 %v833_v42 }
 0x1fa   :  { %843 = vmatprep.subr.mxu1 %v842_v25  ;;  %934 = vmatprep.subr.mxu0 %v839_v28 }
 0x1fb   :  { %849 = vmatpush1.msra.mxu1 %v848_v0  ;;  %937 = vmatpush1.msra.mxu0 %v845_v58 }
 0x1fc   :  { %884 = vmatmul.mubr.f32.vlgmr.msra.gmra.mxu1 %v1903_v5  ;;  %1004 = vmatprep.subr.mxu1 %v1879_v12 }
 0x1fd   :  { %1088 = vmatprep.subr.mxu0 %v804_v51  ;;  %973 = vmatmul.mubr.f32.vlgmr.msra.gmra.mxu0 %v1921_v35 }
 0x1fe   :  { %1006 = vmatpush1.msra.mxu1 %v1881_v36  ;;  %1092 = vmatpush1.msra.mxu0 %v810_v52 }
 0x1ff   :  { %1008 = vmatprep.subr.mxu1 %v1928_v23  ;;  %1096 = vmatprep.subr.mxu0 %v816_v39 }
 0x200   :  { %1010 = vmatpush1.msra.mxu1 %v1930_v24  ;;  %1100 = vmatpush1.msra.mxu0 %v822_v43 }
 0x201   :  { %1012 = vmatprep.subr.mxu1 %v1943_v63  ;;  %1104 = vmatprep.subr.mxu0 %v828_v57 }
 0x202   :  { %1014 = vmatpush1.msra.mxu1 %v1945_v38  ;;  %1108 = vmatpush1.msra.mxu0 %v834_v62 }
 0x203   :  { %1016 = vmatprep.subr.mxu1 %v1955_v13  ;;  %1112 = vmatprep.subr.mxu0 %v840_v61 }
 0x204   :  { %1018 = vmatpush1.msra.mxu1 %v1957_v56  ;;  %1051 = vmatprep.mubr.f32.mxu1 %v1486_v4 }
 0x205   :  { %1116 = vmatpush1.msra.mxu0 %v846_v50  ;;  %1055 = vmatmul.mubr.f32.vlgmr.msra.gmra.mxu1 %v769_v22 }
 0x206   :  { %1182 = vmatprep.subr.mxu1 %v1879_v12  ;;  %1149 = vmatprep.mubr.f32.mxu0 %v1486_v4 }
 0x207   :  { %1184 = vmatpush1.msra.mxu1 %v1881_v36  ;;  %1151 = vmatmul.mubr.f32.vlgmr.msra.gmra.mxu0 %v1903_v5 }
 0x208   :  { %1186 = vmatprep.subr.mxu1 %v1928_v23  ;;  %1229 = vmatprep.mubr.f32.mxu1 %v1486_v4 }
 0x209   :  { %1188 = vmatpush1.msra.mxu1 %v1930_v24 }
 0x20a   :  { %1190 = vmatprep.subr.mxu1 %v1943_v63 }
 0x20b   :  { %1192 = vmatpush1.msra.mxu1 %v1945_v38 }
 0x20c   :  { %1194 = vmatprep.subr.mxu1 %v1955_v13 }
 0x20d   :  { %1196 = vmatpush1.msra.mxu1 %v1957_v56 }
 0x20e   :  { %1231 = vmatmul.mubr.f32.vlgmr.msra.gmra.mxu1 %v1903_v5 }
 0x2b4   :  { %v773_v12 = vpop.f32.mrf.mxu0 }
 0x2b6   :  { %v775_v36 = vpop.f32.mrf.mxu0 }
 0x2bc   :  { %v885_v8 = vpop.f32.mrf.mxu1 }
 0x2bd   :  { %v974_v51 = vpop.f32.mrf.mxu0  ;;  %v886_v52 = vadd.f32 %v885_v8, %v773_v12 }
 0x2be   :  { %v887_v2 = vpop.f32.mrf.mxu1 }
 0x2bf   :  { %v888_v35 = vadd.f32 %v887_v2, %v775_v36  ;;  %v976_v1 = vpop.f32.mrf.mxu0  ;;  %v975_v19 = vadd.f32 %v974_v51, %v886_v52 }
 0x2c1   :  { %v977_v3 = vadd.f32 %v976_v1, %v888_v35 }
 0x2c5   :  { %v1056_v4 = vpop.f32.mrf.mxu1 }
 0x2c6   :  { %v1057_v33 = vadd.f32 %v1056_v4, %v975_v19 }
 0x2c7   :  { %v1058_v29 = vpop.f32.mrf.mxu1  ;;  %v1152_v32 = vpop.f32.mrf.mxu0 }
 0x2c8   :  { %v1059_v30 = vadd.f32 %v1058_v29, %v977_v3  ;;  %v1153_v16 = vadd.f32 %v1152_v32, %v1057_v33 }
 0x2c9   :  { %v1154_v31 = vpop.f32.mrf.mxu0 }
 0x2ca   :  { %v1155_v5 = vadd.f32 %v1154_v31, %v1059_v30 }
 0x2ce   :  { %v1232_v34 = vpop.f32.mrf.mxu1 }
 0x2cf   :  { %v1233_v22 = vadd.f32 %v1232_v34, %v1153_v16 }
 0x2d0   :  { %v1234_v23 = vpop.f32.mrf.mxu1 }
 0x2d1   :  { %1237 = vst [vmem:[#allocation7] sm:$0xff] %v1233_v22  ;;  %v1235_v24 = vadd.f32 %v1234_v23, %v1155_v5 }
 0x2d3   :  { %1238 = vst [vmem:[#allocation7 + $0x8] sm:$0xff] %v1235_v24 }
 0x2d4   :  { %1419 = shalt.err (!%p1416_p0)
}
 0x2d5   :  { %1248 = dma.vmem_to_hbm [thread:$0]  %s1246_s16, 256, %s2005_s5, [#allocation4]  }
 0x2d6   :  { %1432 = dma.done.wait [#allocation4], 256  }
 0x2d7   :  { %1433 = vsyncadd [#allocation4], 4294967040 }
 0x2d8   :  { %1252 = vsyncpa [#allocation3], 1 }
 0x2d9   :  { %1253 = vsyncpa [#allocation6], 1 }
 0x2da   :  { %1254 = vsyncpa [#allocation4], 1 }

</bundles_post_ra>
